<compile_context>
chip_gen: v5e
topology: v5e:2x2
jax: 0.10.0
libtpu: 0.0.40
codegen_flags: <defaults>
</compile_context>

<pallas_src>
import functools

import jax
import jax.numpy as jnp
from jax.experimental import pallas as pl
from jax.experimental.pallas import tpu as pltpu

_LANE = 128
_MIN_TILE = 16                      # bf16 sublane packing: (16, 128) native tile
_SCRATCH_THRESHOLD = 512 * 1024     # bytes / activation buffer before explicit scratch


def _round_up(n, m):
    return ((n + m - 1) // m) * m


def _tpu_params():
    """Returns (vmem_budget, vmem_limit, mxu_dim, n_tensorcores) for the local TPU."""
    kind = ""
    try:
        kind = jax.devices()[0].device_kind.lower()
    except Exception:
        pass
    vmem = None
    try:
        vmem = int(getattr(pltpu.get_tpu_info(), "vmem_capacity_bytes", 0)) or None
    except Exception:
        vmem = None
    if vmem is None:
        # v7x has 64 MiB per TensorCore; v5e/v6e have 128 MiB.  Unknown -> conservative.
        vmem = 64 * 2**20 if ("v7" in kind or not kind) else 128 * 2**20
    mxu = 256 if ("v6" in kind or "v7" in kind) else 128   # v5e MXU is 4x128^2
    n_cores = 2 if "v7" in kind else 1                     # v7x: 2 TCs / chip
    budget = int(vmem * 0.70)          # working-set budget used for tile sizing
    limit = vmem - 16 * 2**20          # scoped-VMEM limit handed to Mosaic
    return budget, limit, mxu, n_cores


def _pad_dim(d, mxu):
    """Lane-dense padding; 256-align on 256x256-MXU chips when the dim exceeds 128."""
    if d <= _LANE or mxu <= _LANE:
        return _round_up(d, _LANE)
    return _round_up(d, mxu)


def _pick_divisor(n, candidates):
    for c in candidates:
        if n % c == 0:
            return c
    return n


def _choose_batch_tile(batch, dims_pad, budget, n_cores):
    """Largest batch tile whose working set fits the budget (None -> stream weights)."""
    # Pallas double-buffers every input by default, including the constant-index
    # weights/biases -> count them twice (bf16 W + f32 b).
    param_bytes = 2 * sum(din * dout * 2 + dout * 4
                          for din, dout in zip(dims_pad[:-1], dims_pad[1:]))
    max_dim = max(dims_pad)
    batch_aligned = _round_up(batch, _MIN_TILE)
    best = None
    for tb in (1024, 512, 256, 128, 64, 32, 16):
        if tb > batch_aligned and tb != _MIN_TILE:
            continue
        io_bytes = 2 * tb * dims_pad[0] * 2 + 2 * tb * dims_pad[-1] * 4  # dbl-buf x(bf16)+out(f32)
        act_bytes = 2 * tb * max_dim * 2 + tb * max_dim * 4              # 2 bf16 ping-pong + f32 acc
        if param_bytes + io_bytes + act_bytes <= budget:
            best = tb
            break
    if best is None:
        return None
    # Make sure a multi-TensorCore chip (v7x) gets >= n_cores parallel grid steps.
    if n_cores > 1 and batch_aligned >= n_cores * _MIN_TILE:
        cap = max(_MIN_TILE, ((batch_aligned // n_cores) // _MIN_TILE) * _MIN_TILE)
        best = min(best, cap)
    return best


# --------------------------------------------------------------------------------------
# Fused whole-MLP kernel (weights VMEM-resident, grid over batch tiles).
# --------------------------------------------------------------------------------------
def _make_fused_kernel(relu_before, dims_pad, use_scratch):
    n_layers = len(relu_before)

    def kernel(*refs):
        # refs = (x, W0, b0, ..., W_{L-1}, b_{L-1}, out[, s0, s1])
        x_ref = refs[0]
        param_refs = refs[1:1 + 2 * n_layers]
        out_ref = refs[1 + 2 * n_layers]
        scratch = refs[2 + 2 * n_layers:]

        h = x_ref[...]                                     # bf16 (tb, d0)
        for i in range(n_layers):
            if relu_before[i]:
                h = jnp.maximum(h, 0)
            w = param_refs[2 * i][...]                     # bf16 (din_p, dout_p)
            b = param_refs[2 * i + 1][...]                 # f32  (1, dout_p)
            acc = jnp.dot(h, w, preferred_element_type=jnp.float32) + b
            if i == n_layers - 1:
                out_ref[...] = acc.astype(out_ref.dtype)
            else:
                hv = acc.astype(jnp.bfloat16)
                if use_scratch:
                    s = scratch[i % 2]                     # explicit bf16 ping-pong buffer
                    dout = dims_pad[i + 1]
                    s[:, :dout] = hv
                    h = s[:, :dout]
                else:
                    h = hv

    return kernel


# --------------------------------------------------------------------------------------
# Weight-streaming fallback: one (M, N, K)-tiled matmul kernel per layer, with the
# preceding ReLU and the bias add fused in.  Used when the parameters do not fit VMEM.
# --------------------------------------------------------------------------------------
def _stream_linear_kernel(x_ref, w_ref, b_ref, o_ref, acc_ref, *, relu_in):
    @pl.when(pl.program_id(2) == 0)
    def _():
        acc_ref[...] = jnp.zeros_like(acc_ref)

    a = x_ref[...]
    if relu_in:
        a = jnp.maximum(a, 0)
    acc_ref[...] += jnp.dot(a, w_ref[...], preferred_element_type=jnp.float32)

    @pl.when(pl.program_id(2) == pl.num_programs(2) - 1)
    def _():
        o_ref[...] = (acc_ref[...] + b_ref[...].astype(jnp.float32)).astype(o_ref.dtype)


def _stream_linear(x_p, w_p, b_p, relu_in, out_dtype, vmem_limit):
    M, K = x_p.shape
    _, N = w_p.shape
    tm = _pick_divisor(M, (256, 128, 64, 32, 16))
    tn = _pick_divisor(N, (512, 256, 128))
    tk = _pick_divisor(K, (512, 256, 128))
    kernel = functools.partial(_stream_linear_kernel, relu_in=relu_in)
    return pl.pallas_call(
        kernel,
        out_shape=jax.ShapeDtypeStruct((M, N), out_dtype),
        grid=(M // tm, N // tn, K // tk),
        in_specs=[pl.BlockSpec((tm, tk), lambda i, j, k: (i, k)),
                  pl.BlockSpec((tk, tn), lambda i, j, k: (k, j)),
                  pl.BlockSpec((1, tn), lambda i, j, k: (0, j))],
        out_specs=pl.BlockSpec((tm, tn), lambda i, j, k: (i, j)),
        scratch_shapes=[pltpu.VMEM((tm, tn), jnp.float32)],
        compiler_params=pltpu.CompilerParams(
            dimension_semantics=("parallel", "parallel", "arbitrary"),
            vmem_limit_bytes=vmem_limit,
        ),
    )(x_p, w_p, b_p)


# --------------------------------------------------------------------------------------
# Public wrapper
# --------------------------------------------------------------------------------------
def mlp_forward(x, weights, biases, final_relu=False,
                force_stream=False, force_scratch=False):
    """MLP forward pass on TPU via Pallas.

    x:       (batch, layer_sizes[0]) float32
    weights: list of (in_i, out_i) float32 arrays  (== PyTorch weight.T)
    biases:  list of (out_i,) float32 arrays
    """
    num_layers = len(weights)
    final_relu_layer = num_layers if final_relu else num_layers - 1
    relu_before = tuple(i < final_relu_layer for i in range(num_layers))

    batch, in_dim = x.shape
    out_dtype = x.dtype
    dims = [in_dim] + [w.shape[1] for w in weights]

    vmem_budget, vmem_limit, mxu, n_cores = _tpu_params()
    dims_pad = [_pad_dim(d, mxu) for d in dims]

    # Zero padding preserves semantics: ReLU(0)=0, zero weight rows/cols and zero
    # bias entries contribute nothing to the real output columns.
    def pad_params():
        flat = []
        for i, (w, b) in enumerate(zip(weights, biases)):
            din, dout = w.shape
            w_p = jnp.zeros((dims_pad[i], dims_pad[i + 1]), jnp.bfloat16)
            w_p = w_p.at[:din, :dout].set(w.astype(jnp.bfloat16))
            b_p = jnp.zeros((1, dims_pad[i + 1]), jnp.float32).at[0, :dout].set(
                b.astype(jnp.float32))
            flat.append((w_p, b_p))
        return flat

    tb = None if force_stream else _choose_batch_tile(batch, dims_pad, vmem_budget, n_cores)

    if tb is None:
        # ---- streaming fallback: weights do not fit VMEM-resident ----
        m_pad = _round_up(batch, _MIN_TILE)
        h = jnp.zeros((m_pad, dims_pad[0]), jnp.bfloat16)
        h = h.at[:batch, :in_dim].set(x.astype(jnp.bfloat16))
        params = pad_params()
        for i, (w_p, b_p) in enumerate(params):
            layer_dtype = out_dtype if i == num_layers - 1 else jnp.bfloat16
            h = _stream_linear(h, w_p, b_p, relu_before[i], layer_dtype, vmem_limit)
        return h[:batch, :dims[-1]]

    # ---- fused path: whole MLP in one kernel, grid over batch tiles ----
    batch_pad = _round_up(batch, tb)
    x_p = jnp.zeros((batch_pad, dims_pad[0]), jnp.bfloat16)
    x_p = x_p.at[:batch, :in_dim].set(x.astype(jnp.bfloat16))

    params_flat = []
    for w_p, b_p in pad_params():
        params_flat.extend([w_p, b_p])

    max_dim = max(dims_pad)
    use_scratch = force_scratch or (tb * max_dim * 2 > _SCRATCH_THRESHOLD)
    kernel = _make_fused_kernel(relu_before, dims_pad, use_scratch)

    # x / out tiled over batch; params are whole-array blocks with a constant
    # index_map so they are DMA'd once and stay VMEM-resident across the grid.
    in_specs = [pl.BlockSpec((tb, dims_pad[0]), lambda i: (i, 0))]
    for li in range(num_layers):
        in_specs.append(pl.BlockSpec((dims_pad[li], dims_pad[li + 1]), lambda i: (0, 0)))
        in_specs.append(pl.BlockSpec((1, dims_pad[li + 1]), lambda i: (0, 0)))
    out_spec = pl.BlockSpec((tb, dims_pad[-1]), lambda i: (i, 0))

    scratch_shapes = ([pltpu.VMEM((tb, max_dim), jnp.bfloat16)] * 2) if use_scratch else ()

    out_p = pl.pallas_call(
        kernel,
        out_shape=jax.ShapeDtypeStruct((batch_pad, dims_pad[-1]), out_dtype),
        grid=(batch_pad // tb,),
        in_specs=in_specs,
        out_specs=out_spec,
        scratch_shapes=scratch_shapes,
        compiler_params=pltpu.CompilerParams(
            dimension_semantics=("parallel",),   # megacore sharding of the batch axis
            vmem_limit_bytes=vmem_limit,
        ),
    )(x_p, *params_flat)

    return out_p[:batch, :dims[-1]]


# --------------------------------------------------------------------------------------
# Reference, init, and self-test
# --------------------------------------------------------------------------------------
def _init_params(key, layer_sizes):
    """Deterministic parameter init (uniform, Linear-style bounds)."""
    weights, biases = [], []
    for i in range(len(layer_sizes) - 1):
        fan_in, fan_out = layer_sizes[i], layer_sizes[i + 1]
        key, wk, bk = jax.random.split(key, 3)
        bound = 1.0 / (fan_in ** 0.5)
        # Stored as (in, out); equivalent to PyTorch weight.T of shape (out, in).
        w = jax.random.uniform(wk, (fan_in, fan_out), jnp.float32, -bound, bound)
        b = jax.random.uniform(bk, (fan_out,), jnp.float32, -bound, bound)
        weights.append(w)
        biases.append(b)
    return weights, biases


def _reference_forward(x, weights, biases, final_relu=False):
    """Pure-JAX f32 reference matching the PyTorch nn.Sequential semantics."""
    num_layers = len(weights)
    final_relu_layer = num_layers if final_relu else num_layers - 1
    h = x
    for i, (w, b) in enumerate(zip(weights, biases)):
        if i < final_relu_layer:
            h = jnp.maximum(h, 0.0)
        h = h @ w + b
    return h


if __name__ == "__main__":
    key = jax.random.PRNGKey(0)
    layer_sizes = [32, 64, 64, 16]
    final_relu = False
    batch = 8

    key, pk, xk = jax.random.split(key, 3)
    weights, biases = _init_params(pk, layer_sizes)
    x = jax.random.normal(xk, (batch, layer_sizes[0]), jnp.float32)

    ref = _reference_forward(x, weights, biases, final_relu=final_relu)

    # Exercise all three code paths: fused, fused + explicit scratch, weight-streaming.
    variants = {
        "fused": jax.jit(functools.partial(mlp_forward, final_relu=final_relu)),
        "fused_scratch": jax.jit(functools.partial(
            mlp_forward, final_relu=final_relu, force_scratch=True)),
        "streamed": jax.jit(functools.partial(
            mlp_forward, final_relu=final_relu, force_stream=True)),
    }

    for name, fwd in variants.items():
        out = jax.block_until_ready(fwd(x, weights, biases))
        assert out.shape == (batch, layer_sizes[-1]), name
        # bf16 MXU inputs/activations with f32 accumulation vs. pure-f32 reference.
        assert jnp.allclose(out, ref, atol=5e-2, rtol=5e-2), f"mismatch vs reference: {name}"

    print("KERNEL_OK")
</pallas_src>

<mosaic_0001>
module attributes {stable_mosaic.version = 11 : i64} {
  func.func @kernel(%arg0: i32, %arg1: memref<16x128xbf16, #tpu.memory_space<vmem>>, %arg2: memref<128x128xbf16, #tpu.memory_space<vmem>>, %arg3: memref<1x128xf32, #tpu.memory_space<vmem>>, %arg4: memref<128x128xbf16, #tpu.memory_space<vmem>>, %arg5: memref<1x128xf32, #tpu.memory_space<vmem>>, %arg6: memref<128x128xbf16, #tpu.memory_space<vmem>>, %arg7: memref<1x128xf32, #tpu.memory_space<vmem>>, %arg8: memref<16x128xf32, #tpu.memory_space<vmem>>) attributes {dimension_semantics = [#tpu.dimension_semantics<parallel>], iteration_bounds = array<i64: 1>, scalar_prefetch = 0 : i64, scratch_operands = 0 : i64, tpu.core_type = #tpu.core_type<tc>, window_params = [{transform_indices = @transform_0, window_bounds = array<i64: 16, 128>}, {pipeline_mode = #tpu.pipeline_mode<synchronous>, transform_indices = @transform_1, window_bounds = array<i64: 128, 128>}, {pipeline_mode = #tpu.pipeline_mode<synchronous>, transform_indices = @transform_2, window_bounds = array<i64: 1, 128>}, {pipeline_mode = #tpu.pipeline_mode<synchronous>, transform_indices = @transform_3, window_bounds = array<i64: 128, 128>}, {pipeline_mode = #tpu.pipeline_mode<synchronous>, transform_indices = @transform_4, window_bounds = array<i64: 1, 128>}, {pipeline_mode = #tpu.pipeline_mode<synchronous>, transform_indices = @transform_5, window_bounds = array<i64: 128, 128>}, {pipeline_mode = #tpu.pipeline_mode<synchronous>, transform_indices = @transform_6, window_bounds = array<i64: 1, 128>}, {transform_indices = @transform_7, window_bounds = array<i64: 16, 128>}]} {
    %c0 = arith.constant 0 : index
    %c0_0 = arith.constant 0 : index
    %0 = vector.load %arg1[%c0, %c0_0] : memref<16x128xbf16, #tpu.memory_space<vmem>>, vector<16x128xbf16>
    %cst = arith.constant 0.000000e+00 : bf16
    %1 = vector.broadcast %cst : bf16 to vector<16x128xbf16>
    %2 = arith.maximumf %0, %1 : vector<16x128xbf16>
    %c0_1 = arith.constant 0 : index
    %c0_2 = arith.constant 0 : index
    %3 = vector.load %arg2[%c0_1, %c0_2] : memref<128x128xbf16, #tpu.memory_space<vmem>>, vector<128x128xbf16>
    %c0_3 = arith.constant 0 : index
    %c0_4 = arith.constant 0 : index
    %4 = vector.load %arg3[%c0_3, %c0_4] : memref<1x128xf32, #tpu.memory_space<vmem>>, vector<1x128xf32>
    %cst_5 = arith.constant dense<0.000000e+00> : vector<16x128xf32>
    %5 = tpu.matmul %2, %3, %cst_5 {dimension_numbers = #tpu.dot_dimension_numbers<[1], [0], [0], [1], [0, 0, 1, 1], [], []>} : vector<16x128xbf16>, vector<128x128xbf16>, vector<16x128xf32> -> vector<16x128xf32>
    %6 = vector.broadcast %4 : vector<1x128xf32> to vector<16x128xf32>
    %7 = arith.addf %5, %6 : vector<16x128xf32>
    %8 = arith.truncf %7 : vector<16x128xf32> to vector<16x128xbf16>
    %cst_6 = arith.constant 0.000000e+00 : bf16
    %9 = vector.broadcast %cst_6 : bf16 to vector<16x128xbf16>
    %10 = arith.maximumf %8, %9 : vector<16x128xbf16>
    %c0_7 = arith.constant 0 : index
    %c0_8 = arith.constant 0 : index
    %11 = vector.load %arg4[%c0_7, %c0_8] : memref<128x128xbf16, #tpu.memory_space<vmem>>, vector<128x128xbf16>
    %c0_9 = arith.constant 0 : index
    %c0_10 = arith.constant 0 : index
    %12 = vector.load %arg5[%c0_9, %c0_10] : memref<1x128xf32, #tpu.memory_space<vmem>>, vector<1x128xf32>
    %cst_11 = arith.constant dense<0.000000e+00> : vector<16x128xf32>
    %13 = tpu.matmul %10, %11, %cst_11 {dimension_numbers = #tpu.dot_dimension_numbers<[1], [0], [0], [1], [0, 0, 1, 1], [], []>} : vector<16x128xbf16>, vector<128x128xbf16>, vector<16x128xf32> -> vector<16x128xf32>
    %14 = vector.broadcast %12 : vector<1x128xf32> to vector<16x128xf32>
    %15 = arith.addf %13, %14 : vector<16x128xf32>
    %16 = arith.truncf %15 : vector<16x128xf32> to vector<16x128xbf16>
    %c0_12 = arith.constant 0 : index
    %c0_13 = arith.constant 0 : index
    %17 = vector.load %arg6[%c0_12, %c0_13] : memref<128x128xbf16, #tpu.memory_space<vmem>>, vector<128x128xbf16>
    %c0_14 = arith.constant 0 : index
    %c0_15 = arith.constant 0 : index
    %18 = vector.load %arg7[%c0_14, %c0_15] : memref<1x128xf32, #tpu.memory_space<vmem>>, vector<1x128xf32>
    %cst_16 = arith.constant dense<0.000000e+00> : vector<16x128xf32>
    %19 = tpu.matmul %16, %17, %cst_16 {dimension_numbers = #tpu.dot_dimension_numbers<[1], [0], [0], [1], [0, 0, 1, 1], [], []>} : vector<16x128xbf16>, vector<128x128xbf16>, vector<16x128xf32> -> vector<16x128xf32>
    %20 = vector.broadcast %18 : vector<1x128xf32> to vector<16x128xf32>
    %21 = arith.addf %19, %20 : vector<16x128xf32>
    %c0_17 = arith.constant 0 : index
    %c0_18 = arith.constant 0 : index
    %22 = vector.load %arg8[%c0_17, %c0_18] : memref<16x128xf32, #tpu.memory_space<vmem>>, vector<16x128xf32>
    tpu.vector_store %arg8[%c0_17, %c0_18], %21 {strides = array<i32>} : memref<16x128xf32, #tpu.memory_space<vmem>>, vector<16x128xf32>,
    return
  }
  func.func @transform_0(%arg0: i32) -> (i32, i32) {
    %c0_i32 = arith.constant 0 : i32
    %c0_i32_0 = arith.constant 0 : i32
    return %arg0, %c0_i32 : i32, i32
  }
  func.func @transform_1(%arg0: i32) -> (i32, i32) {
    %c0_i32 = arith.constant 0 : i32
    %c0_i32_0 = arith.constant 0 : i32
    %c0_i32_1 = arith.constant 0 : i32
    return %c0_i32, %c0_i32_0 : i32, i32
  }
  func.func @transform_2(%arg0: i32) -> (i32, i32) {
    %c0_i32 = arith.constant 0 : i32
    %c0_i32_0 = arith.constant 0 : i32
    %c0_i32_1 = arith.constant 0 : i32
    return %c0_i32, %c0_i32_0 : i32, i32
  }
  func.func @transform_3(%arg0: i32) -> (i32, i32) {
    %c0_i32 = arith.constant 0 : i32
    %c0_i32_0 = arith.constant 0 : i32
    %c0_i32_1 = arith.constant 0 : i32
    return %c0_i32, %c0_i32_0 : i32, i32
  }
  func.func @transform_4(%arg0: i32) -> (i32, i32) {
    %c0_i32 = arith.constant 0 : i32
    %c0_i32_0 = arith.constant 0 : i32
    %c0_i32_1 = arith.constant 0 : i32
    return %c0_i32, %c0_i32_0 : i32, i32
  }
  func.func @transform_5(%arg0: i32) -> (i32, i32) {
    %c0_i32 = arith.constant 0 : i32
    %c0_i32_0 = arith.constant 0 : i32
    %c0_i32_1 = arith.constant 0 : i32
    return %c0_i32, %c0_i32_0 : i32, i32
  }
  func.func @transform_6(%arg0: i32) -> (i32, i32) {
    %c0_i32 = arith.constant 0 : i32
    %c0_i32_0 = arith.constant 0 : i32
    %c0_i32_1 = arith.constant 0 : i32
    return %c0_i32, %c0_i32_0 : i32, i32
  }
  func.func @transform_7(%arg0: i32) -> (i32, i32) {
    %c0_i32 = arith.constant 0 : i32
    %c0_i32_0 = arith.constant 0 : i32
    return %arg0, %c0_i32 : i32, i32
  }
}

</mosaic_0001>

<bundles_post_ra>
// kernel: mlp_forward.1
= control target key start
LH: loop header
LB: loop body
LE: loop exit
PB: predicated region body
PF: predicated region fallthrough
CT: control target
= control target key end

     0   :  { %s550_s1 = inlined_call_operand.vmem [shape: bf16[128,128], index: 1, kind: input, shape index: {}]   ;;  %s551_s3 = inlined_call_operand.vmem [shape: bf16[128,128], index: 3, kind: input, shape index: {}]   ;;  %s552_s2 = inlined_call_operand.vmem [shape: f32[1,128], index: 2, kind: input, shape index: {}]   ;;  %s553_s0 = inlined_call_operand.vmem [shape: bf16[16,128], index: 0, kind: input, shape index: {}]   ;;  %s554_s4 = inlined_call_operand.vmem [shape: f32[1,128], index: 4, kind: input, shape index: {}]   ;;  %s555_s5 = inlined_call_operand.vmem [shape: bf16[128,128], index: 5, kind: input, shape index: {}]   ;;  %s556_s6 = inlined_call_operand.vmem [shape: f32[1,128], index: 6, kind: input, shape index: {}]   ;;  %s557_s7 = inlined_call_operand.vmem [shape: f32[16,128], index: 7, kind: output, shape index: {}]  }
   0x1   :  { %v396_v0 = vld [vmem:[%s550_s1 + $0x38] sm:$0xff]  ;;  %v395_v1 = vld [vmem:[%s550_s1 + $0x30] sm:$0xff]  ;;  %v394_v4 = vld [vmem:[%s550_s1 + $0x28] sm:$0xff] }
   0x2   :  { %101 = vmatpush.bf16.msra.mxu0 %v396_v0  ;;  %v404_v2 = vld [vmem:[%s551_s3 + $0x38] sm:$0xff]  ;;  %v403_v3 = vld [vmem:[%s551_s3 + $0x30] sm:$0xff]  ;;  %v402_v5 = vld [vmem:[%s551_s3 + $0x28] sm:$0xff] }
   0x3   :  { %190 = vmatpush.bf16.msra.mxu1 %v404_v2  ;;  %v393_v6 = vld [vmem:[%s550_s1 + $0x20] sm:$0xff]  ;;  %v392_v8 = vld [vmem:[%s550_s1 + $0x18] sm:$0xff]  ;;  %v391_v9 = vld [vmem:[%s550_s1 + $0x10] sm:$0xff] }
   0x4   :  { %v401_v7 = vld [vmem:[%s551_s3 + $0x20] sm:$0xff]  ;;  %v390_v13 = vld [vmem:[%s550_s1 + $0x8] sm:$0xff]  ;;  %v400_v18 = vld [vmem:[%s551_s3 + $0x18] sm:$0xff] }
   0x5   :  { %v414_v10 = vld [vmem:[%s553_s0] sm:$0xff]   ;;  %v399_v19 = vld [vmem:[%s551_s3 + $0x10] sm:$0xff]  ;;  %v398_v20 = vld [vmem:[%s551_s3 + $0x8] sm:$0xff] }
   0x6   :  { %102 = vmatpush.bf16.msra.mxu0 %v395_v1  ;;  %v415_v11 = vunpack.c.l.bf16 %v414_v10  ;;  %v416_v12 = vunpack.c.h.bf16 %v414_v10  ;;  %v389_v16 = vld [vmem:[%s550_s1] sm:$0xff]  ;;  %v412_v22 = vld [vmem:[%s555_s5 + $0x38] sm:$0xff]  ;;  %v411_v23 = vld [vmem:[%s555_s5 + $0x30] sm:$0xff] }
   0x7   :  { %191 = vmatpush.bf16.msra.mxu1 %v403_v3  ;;  %v397_v21 = vld [vmem:[%s551_s3] sm:$0xff]  ;;  %273 = vmatpush.bf16.msra.mxu2 %v412_v22  ;;  %v410_v24 = vld [vmem:[%s555_s5 + $0x28] sm:$0xff]  ;;  %v408_v26 = vld [vmem:[%s555_s5 + $0x18] sm:$0xff] }
   0x8   :  { %v30_v14 = vmax.f32 %v415_v11, 0.0  ;;  %v31_v15 = vmax.f32 %v416_v12, 0.0  ;;  %v409_v25 = vld [vmem:[%s555_s5 + $0x20] sm:$0xff]  ;;  %v407_v35 = vld [vmem:[%s555_s5 + $0x10] sm:$0xff]  ;;  %v406_v36 = vld [vmem:[%s555_s5 + $0x8] sm:$0xff] }
   0x9   :  { %v417_v28 = vld [vmem:[%s552_s2] ss:$0 sm:$0xff] }
   0xa   :  { %103 = vmatpush.bf16.msra.mxu0 %v394_v4  ;;  %v32_v17 = vpack.c.bf16 %v31_v15, %v30_v14  ;;  %v405_v37 = vld [vmem:[%s555_s5] sm:$0xff] }
   0xb   :  { %192 = vmatpush.bf16.msra.mxu1 %v402_v5  ;;  %274 = vmatpush.bf16.msra.mxu2 %v411_v23  ;;  %v418_v39 = vld [vmem:[%s554_s4] ss:$0 sm:$0xff] }
   0xc   :  { %v419_v44 = vld [vmem:[%s556_s6] ss:$0 sm:$0xff] }
   0xe   :  { %104 = vmatpush.bf16.msra.mxu0 %v393_v6 }
   0xf   :  { %193 = vmatpush.bf16.msra.mxu1 %v401_v7  ;;  %275 = vmatpush.bf16.msra.mxu2 %v410_v24 }
  0x12   :  { %105 = vmatpush.bf16.msra.mxu0 %v392_v8 }
  0x13   :  { %194 = vmatpush.bf16.msra.mxu1 %v400_v18  ;;  %276 = vmatpush.bf16.msra.mxu2 %v409_v25 }
  0x16   :  { %106 = vmatpush.bf16.msra.mxu0 %v391_v9 }
  0x17   :  { %195 = vmatpush.bf16.msra.mxu1 %v399_v19  ;;  %277 = vmatpush.bf16.msra.mxu2 %v408_v26 }
  0x1a   :  { %107 = vmatpush.bf16.msra.mxu0 %v390_v13 }
  0x1b   :  { %196 = vmatpush.bf16.msra.mxu1 %v398_v20  ;;  %278 = vmatpush.bf16.msra.mxu2 %v407_v35 }
  0x1e   :  { %108 = vmatpush.bf16.msra.mxu0 %v389_v16 }
  0x1f   :  { %197 = vmatpush.bf16.msra.mxu1 %v397_v21  ;;  %279 = vmatpush.bf16.msra.mxu2 %v406_v36 }
  0x21   :  { %109 = vmatmul.bf16.vlgmr.msra.gmra.mxu0 %v32_v17 }
  0x23   :  { %280 = vmatpush.bf16.msra.mxu2 %v405_v37 }
  0x9e   :  { %v110_v27 = vpop.f32.mrf.mxu0 }
  0x9f   :  { %v111_v29 = vadd.f32 %v417_v28, %v110_v27 }
  0xa1   :  { %v119_v32 = vmax.f32 %v111_v29, 0.0 }
  0xa6   :  { %v112_v30 = vpop.f32.mrf.mxu0 }
  0xa7   :  { %v113_v31 = vadd.f32 %v417_v28, %v112_v30 }
  0xa9   :  { %v120_v33 = vmax.f32 %v113_v31, 0.0 }
  0xab   :  { %v121_v34 = vpack.c.bf16 %v120_v33, %v119_v32 }
  0xad   :  { %198 = vmatmul.bf16.vlgmr.msra.gmra.mxu1 %v121_v34 }
 0x12a   :  { %v199_v38 = vpop.f32.mrf.mxu1 }
 0x12b   :  { %v200_v41 = vadd.f32 %v418_v39, %v199_v38 }
 0x132   :  { %v201_v40 = vpop.f32.mrf.mxu1 }
 0x133   :  { %v202_v42 = vadd.f32 %v418_v39, %v201_v40 }
 0x135   :  { %v204_v43 = vpack.c.bf16 %v202_v42, %v200_v41 }
 0x137   :  { %281 = vmatmul.bf16.vlgmr.msra.gmra.mxu2 %v204_v43 }
 0x1ba   :  { %v282_v45 = vpop.f32.mrf.mxu2 }
 0x1bb   :  { %v283_v46 = vadd.f32 %v419_v44, %v282_v45 }
 0x1bd   :  { %287 = vst [vmem:[%s557_s7] sm:$0xff] %v283_v46 }
 0x1c2   :  { %v284_v47 = vpop.f32.mrf.mxu2 }
 0x1c3   :  { %v285_v48 = vadd.f32 %v419_v44, %v284_v47 }
 0x1c5   :  { %288 = vst [vmem:[%s557_s7 + $0x8] sm:$0xff] %v285_v48 }

</bundles_post_ra>
